<compile_context>
chip_gen: v6e
topology: v6e:2x2x1
jax: 0.10.0
libtpu: 0.0.40
codegen_flags: <defaults>
</compile_context>

<pallas_src>
import jax
import jax.numpy as jnp
from jax.experimental import pallas as pl
from jax.experimental.pallas import tpu as pltpu

STATE_SIZE = 1 + 3 * 3 + 3 * 3 + 1 + 3 * 3 + 3 * 3 + 2   # = 40
ACTION_SIZE = 4
HIDDEN = (256, 128, 64)

LANE = 128        # intermediate activations stay lane-dense at 128
OUT_LANES = 8     # final layer padded only to 8 lanes -> 16x less writeback
MAX_BATCH_TILE = 1024


def _round_up(x, m):
    return ((x + m - 1) // m) * m


def _qnet_kernel(x_ref,
                 w1_ref, b1_ref,
                 w2_ref, b2_ref,
                 w3_ref, b3_ref,
                 w4_ref, b4_ref,
                 o_ref):
    """All four Linear layers + ReLUs fused, VMEM-resident.

    Dots feed the MXU in bf16 with f32 accumulation; bias-add / ReLU stay in
    f32 so v5e's f32-only VPU is not penalized.
    """
    x = x_ref[...].astype(jnp.bfloat16)
    h = jnp.dot(x, w1_ref[...], preferred_element_type=jnp.float32) + b1_ref[...]
    h = jnp.maximum(h, 0.0)
    h = jnp.dot(h.astype(jnp.bfloat16), w2_ref[...],
                preferred_element_type=jnp.float32) + b2_ref[...]
    h = jnp.maximum(h, 0.0)
    h = jnp.dot(h.astype(jnp.bfloat16), w3_ref[...],
                preferred_element_type=jnp.float32) + b3_ref[...]
    h = jnp.maximum(h, 0.0)
    o_ref[...] = (jnp.dot(h.astype(jnp.bfloat16), w4_ref[...],
                          preferred_element_type=jnp.float32) + b4_ref[...])


def init_params(key, state_size=STATE_SIZE, action_size=ACTION_SIZE):
    """PyTorch nn.Linear-style init: U(-1/sqrt(fan_in), 1/sqrt(fan_in)).

    Weights stored transposed vs. torch ((in, out)). Layer 3 output is padded
    64 -> 128 (intermediates stay lane-dense in VMEM); layer 4 input padded
    64 -> 128 and output padded action_size -> 8 (only 8 lanes hit HBM).
    Zero rows/cols are mathematically inert; extra output lanes are sliced
    off in the wrapper. Weights cast to bf16 once here; biases stay f32.
    """
    dims = [state_size, *HIDDEN, action_size]
    raw = []
    for i in range(4):
        fan_in, fan_out = dims[i], dims[i + 1]
        key, kw, kb = jax.random.split(key, 3)
        bound = 1.0 / float(fan_in) ** 0.5
        w = jax.random.uniform(kw, (fan_in, fan_out), jnp.float32, -bound, bound)
        b = jax.random.uniform(kb, (1, fan_out), jnp.float32, -bound, bound)
        raw.append((w, b))

    (w1, b1), (w2, b2), (w3, b3), (w4, b4) = raw

    h3 = HIDDEN[2]
    w3p = jnp.zeros((HIDDEN[1], LANE), jnp.float32).at[:, :h3].set(w3)
    b3p = jnp.zeros((1, LANE), jnp.float32).at[:, :h3].set(b3)
    w4p = jnp.zeros((LANE, OUT_LANES), jnp.float32).at[:h3, :action_size].set(w4)
    b4p = jnp.zeros((1, OUT_LANES), jnp.float32).at[:, :action_size].set(b4)

    return (
        (w1.astype(jnp.bfloat16), b1),
        (w2.astype(jnp.bfloat16), b2),
        (w3p.astype(jnp.bfloat16), b3p),
        (w4p.astype(jnp.bfloat16), b4p),
    )


def _pick_batch_tile(batch):
    """Batch tile: large (up to 1024) to amortize per-step overhead, but with
    >= 2 grid steps for big batches so v7x's two TensorCores both participate.
    Always a multiple of 8 (sublane)."""
    if batch <= 128:
        return _round_up(max(batch, 1), 8)
    bt = _round_up((batch + 1) // 2, 8)       # at least two grid steps
    return min(bt, MAX_BATCH_TILE)


@jax.jit
def qnetwork_forward(state, params):
    """state: (batch, STATE_SIZE) -> (batch, ACTION_SIZE) float32."""
    (w1, b1), (w2, b2), (w3, b3), (w4, b4) = params
    batch = state.shape[0]

    bt = _pick_batch_tile(batch)
    grid = (pl.cdiv(batch, bt),)   # ragged last block handled by Pallas

    x = state.astype(jnp.float32)

    # Weights / biases: full-array blocks with a constant index_map, so they
    # are fetched once and stay VMEM-resident across batch tiles.
    const2d = lambda a: pl.BlockSpec(a.shape, lambda i: (0, 0))

    mac = (STATE_SIZE * HIDDEN[0] + HIDDEN[0] * HIDDEN[1]
           + HIDDEN[1] * LANE + LANE * OUT_LANES)
    weight_bytes = (2 * mac + 4 * (HIDDEN[0] + HIDDEN[1] + LANE + OUT_LANES))
    cost = pl.CostEstimate(
        flops=2 * batch * mac,
        transcendentals=0,
        bytes_accessed=4 * batch * STATE_SIZE + weight_bytes
                       + 4 * batch * OUT_LANES,
    )

    out = pl.pallas_call(
        _qnet_kernel,
        out_shape=jax.ShapeDtypeStruct((batch, OUT_LANES), jnp.float32),
        grid=grid,
        in_specs=[
            pl.BlockSpec((bt, STATE_SIZE), lambda i: (i, 0)),  # activations
            const2d(w1), const2d(b1),
            const2d(w2), const2d(b2),
            const2d(w3), const2d(b3),
            const2d(w4), const2d(b4),
        ],
        out_specs=pl.BlockSpec((bt, OUT_LANES), lambda i: (i, 0)),
        compiler_params=pltpu.CompilerParams(
            dimension_semantics=("parallel",)),  # v7x: shard batch over 2 TCs
        cost_estimate=cost,
    )(x, w1, b1, w2, b2, w3, b3, w4, b4)

    return out[:, :ACTION_SIZE]


def _reference_forward(state, params):
    """Pure-JAX reference using the same bf16 weights / f32 accumulation."""
    x = state.astype(jnp.float32)
    for i, (w, b) in enumerate(params):
        x = jnp.dot(x.astype(jnp.bfloat16), w,
                    preferred_element_type=jnp.float32) + b
        if i < 3:
            x = jnp.maximum(x, 0.0)
    return x[:, :ACTION_SIZE]


if __name__ == "__main__":
    key = jax.random.PRNGKey(0)
    kparams, kstate = jax.random.split(key)

    params = init_params(kparams)

    # Small primary test (batch=2) — exercises the ragged single-block path.
    batch = 2
    state = jax.random.normal(kstate, (batch, STATE_SIZE), jnp.float32)

    q_values = jax.block_until_ready(qnetwork_forward(state, params))
    ref = _reference_forward(state, params)
    assert q_values.shape == (batch, ACTION_SIZE)
    assert jnp.allclose(q_values, ref, atol=1e-3, rtol=1e-3), (
        "Pallas kernel output mismatch vs reference (batch=2)")

    # Extra check: multi-step grid (2 steps) with a ragged final block.
    batch2 = 200
    state2 = jax.random.normal(jax.random.PRNGKey(1), (batch2, STATE_SIZE),
                               jnp.float32)
    q2 = jax.block_until_ready(qnetwork_forward(state2, params))
    ref2 = _reference_forward(state2, params)
    assert q2.shape == (batch2, ACTION_SIZE)
    assert jnp.allclose(q2, ref2, atol=1e-3, rtol=1e-3), (
        "Pallas kernel output mismatch vs reference (batch=200)")

    print("KERNEL_OK")
</pallas_src>

<mosaic_0001>
module attributes {stable_mosaic.version = 11 : i64} {
  func.func @_qnet_kernel(%arg0: i32, %arg1: memref<8x40xf32, #tpu.memory_space<vmem>>, %arg2: memref<40x256xbf16, #tpu.memory_space<vmem>>, %arg3: memref<1x256xf32, #tpu.memory_space<vmem>>, %arg4: memref<256x128xbf16, #tpu.memory_space<vmem>>, %arg5: memref<1x128xf32, #tpu.memory_space<vmem>>, %arg6: memref<128x128xbf16, #tpu.memory_space<vmem>>, %arg7: memref<1x128xf32, #tpu.memory_space<vmem>>, %arg8: memref<128x8xbf16, #tpu.memory_space<vmem>>, %arg9: memref<1x8xf32, #tpu.memory_space<vmem>>, %arg10: memref<8x8xf32, #tpu.memory_space<vmem>>) attributes {dimension_semantics = [#tpu.dimension_semantics<parallel>], iteration_bounds = array<i64: 1>, scalar_prefetch = 0 : i64, scratch_operands = 0 : i64, tpu.core_type = #tpu.core_type<tc>, window_params = [{transform_indices = @transform_0, window_bounds = array<i64: 8, 40>}, {pipeline_mode = #tpu.pipeline_mode<synchronous>, transform_indices = @transform_1, window_bounds = array<i64: 40, 256>}, {pipeline_mode = #tpu.pipeline_mode<synchronous>, transform_indices = @transform_2, window_bounds = array<i64: 1, 256>}, {pipeline_mode = #tpu.pipeline_mode<synchronous>, transform_indices = @transform_3, window_bounds = array<i64: 256, 128>}, {pipeline_mode = #tpu.pipeline_mode<synchronous>, transform_indices = @transform_4, window_bounds = array<i64: 1, 128>}, {pipeline_mode = #tpu.pipeline_mode<synchronous>, transform_indices = @transform_5, window_bounds = array<i64: 128, 128>}, {pipeline_mode = #tpu.pipeline_mode<synchronous>, transform_indices = @transform_6, window_bounds = array<i64: 1, 128>}, {pipeline_mode = #tpu.pipeline_mode<synchronous>, transform_indices = @transform_7, window_bounds = array<i64: 128, 8>}, {pipeline_mode = #tpu.pipeline_mode<synchronous>, transform_indices = @transform_8, window_bounds = array<i64: 1, 8>}, {transform_indices = @transform_9, window_bounds = array<i64: 8, 8>}]} {
    %c0 = arith.constant 0 : index
    %c0_0 = arith.constant 0 : index
    %0 = vector.load %arg1[%c0, %c0_0] : memref<8x40xf32, #tpu.memory_space<vmem>>, vector<8x40xf32>
    %1 = arith.truncf %0 : vector<8x40xf32> to vector<8x40xbf16>
    %c0_1 = arith.constant 0 : index
    %c0_2 = arith.constant 0 : index
    %2 = vector.load %arg2[%c0_1, %c0_2] : memref<40x256xbf16, #tpu.memory_space<vmem>>, vector<40x256xbf16>
    %cst = arith.constant dense<0.000000e+00> : vector<8x256xf32>
    %3 = tpu.matmul %1, %2, %cst {dimension_numbers = #tpu.dot_dimension_numbers<[1], [0], [0], [1], [0, 0, 1, 1], [], []>} : vector<8x40xbf16>, vector<40x256xbf16>, vector<8x256xf32> -> vector<8x256xf32>
    %c0_3 = arith.constant 0 : index
    %c0_4 = arith.constant 0 : index
    %4 = vector.load %arg3[%c0_3, %c0_4] : memref<1x256xf32, #tpu.memory_space<vmem>>, vector<1x256xf32>
    %5 = vector.broadcast %4 : vector<1x256xf32> to vector<8x256xf32>
    %6 = arith.addf %3, %5 : vector<8x256xf32>
    %cst_5 = arith.constant 0.000000e+00 : f32
    %7 = vector.broadcast %cst_5 : f32 to vector<8x256xf32>
    %8 = arith.maximumf %6, %7 : vector<8x256xf32>
    %9 = arith.truncf %8 : vector<8x256xf32> to vector<8x256xbf16>
    %c0_6 = arith.constant 0 : index
    %c0_7 = arith.constant 0 : index
    %10 = vector.load %arg4[%c0_6, %c0_7] : memref<256x128xbf16, #tpu.memory_space<vmem>>, vector<256x128xbf16>
    %cst_8 = arith.constant dense<0.000000e+00> : vector<8x128xf32>
    %11 = tpu.matmul %9, %10, %cst_8 {dimension_numbers = #tpu.dot_dimension_numbers<[1], [0], [0], [1], [0, 0, 1, 1], [], []>} : vector<8x256xbf16>, vector<256x128xbf16>, vector<8x128xf32> -> vector<8x128xf32>
    %c0_9 = arith.constant 0 : index
    %c0_10 = arith.constant 0 : index
    %12 = vector.load %arg5[%c0_9, %c0_10] : memref<1x128xf32, #tpu.memory_space<vmem>>, vector<1x128xf32>
    %13 = vector.broadcast %12 : vector<1x128xf32> to vector<8x128xf32>
    %14 = arith.addf %11, %13 : vector<8x128xf32>
    %cst_11 = arith.constant 0.000000e+00 : f32
    %15 = vector.broadcast %cst_11 : f32 to vector<8x128xf32>
    %16 = arith.maximumf %14, %15 : vector<8x128xf32>
    %17 = arith.truncf %16 : vector<8x128xf32> to vector<8x128xbf16>
    %c0_12 = arith.constant 0 : index
    %c0_13 = arith.constant 0 : index
    %18 = vector.load %arg6[%c0_12, %c0_13] : memref<128x128xbf16, #tpu.memory_space<vmem>>, vector<128x128xbf16>
    %cst_14 = arith.constant dense<0.000000e+00> : vector<8x128xf32>
    %19 = tpu.matmul %17, %18, %cst_14 {dimension_numbers = #tpu.dot_dimension_numbers<[1], [0], [0], [1], [0, 0, 1, 1], [], []>} : vector<8x128xbf16>, vector<128x128xbf16>, vector<8x128xf32> -> vector<8x128xf32>
    %c0_15 = arith.constant 0 : index
    %c0_16 = arith.constant 0 : index
    %20 = vector.load %arg7[%c0_15, %c0_16] : memref<1x128xf32, #tpu.memory_space<vmem>>, vector<1x128xf32>
    %21 = vector.broadcast %20 : vector<1x128xf32> to vector<8x128xf32>
    %22 = arith.addf %19, %21 : vector<8x128xf32>
    %cst_17 = arith.constant 0.000000e+00 : f32
    %23 = vector.broadcast %cst_17 : f32 to vector<8x128xf32>
    %24 = arith.maximumf %22, %23 : vector<8x128xf32>
    %25 = arith.truncf %24 : vector<8x128xf32> to vector<8x128xbf16>
    %c0_18 = arith.constant 0 : index
    %c0_19 = arith.constant 0 : index
    %26 = vector.load %arg8[%c0_18, %c0_19] : memref<128x8xbf16, #tpu.memory_space<vmem>>, vector<128x8xbf16>
    %cst_20 = arith.constant dense<0.000000e+00> : vector<8x8xf32>
    %27 = tpu.matmul %25, %26, %cst_20 {dimension_numbers = #tpu.dot_dimension_numbers<[1], [0], [0], [1], [0, 0, 1, 1], [], []>} : vector<8x128xbf16>, vector<128x8xbf16>, vector<8x8xf32> -> vector<8x8xf32>
    %c0_21 = arith.constant 0 : index
    %c0_22 = arith.constant 0 : index
    %28 = vector.load %arg9[%c0_21, %c0_22] : memref<1x8xf32, #tpu.memory_space<vmem>>, vector<1x8xf32>
    %29 = vector.broadcast %28 : vector<1x8xf32> to vector<8x8xf32>
    %30 = arith.addf %27, %29 : vector<8x8xf32>
    %c0_23 = arith.constant 0 : index
    %c0_24 = arith.constant 0 : index
    %31 = vector.load %arg10[%c0_23, %c0_24] : memref<8x8xf32, #tpu.memory_space<vmem>>, vector<8x8xf32>
    tpu.vector_store %arg10[%c0_23, %c0_24], %30 {strides = array<i32>} : memref<8x8xf32, #tpu.memory_space<vmem>>, vector<8x8xf32>,
    return
  }
  func.func @transform_0(%arg0: i32) -> (i32, i32) {
    %c0_i32 = arith.constant 0 : i32
    %c0_i32_0 = arith.constant 0 : i32
    return %arg0, %c0_i32 : i32, i32
  }
  func.func @transform_1(%arg0: i32) -> (i32, i32) {
    %c0_i32 = arith.constant 0 : i32
    %c0_i32_0 = arith.constant 0 : i32
    %c0_i32_1 = arith.constant 0 : i32
    return %c0_i32, %c0_i32_0 : i32, i32
  }
  func.func @transform_2(%arg0: i32) -> (i32, i32) {
    %c0_i32 = arith.constant 0 : i32
    %c0_i32_0 = arith.constant 0 : i32
    %c0_i32_1 = arith.constant 0 : i32
    return %c0_i32, %c0_i32_0 : i32, i32
  }
  func.func @transform_3(%arg0: i32) -> (i32, i32) {
    %c0_i32 = arith.constant 0 : i32
    %c0_i32_0 = arith.constant 0 : i32
    %c0_i32_1 = arith.constant 0 : i32
    return %c0_i32, %c0_i32_0 : i32, i32
  }
  func.func @transform_4(%arg0: i32) -> (i32, i32) {
    %c0_i32 = arith.constant 0 : i32
    %c0_i32_0 = arith.constant 0 : i32
    %c0_i32_1 = arith.constant 0 : i32
    return %c0_i32, %c0_i32_0 : i32, i32
  }
  func.func @transform_5(%arg0: i32) -> (i32, i32) {
    %c0_i32 = arith.constant 0 : i32
    %c0_i32_0 = arith.constant 0 : i32
    %c0_i32_1 = arith.constant 0 : i32
    return %c0_i32, %c0_i32_0 : i32, i32
  }
  func.func @transform_6(%arg0: i32) -> (i32, i32) {
    %c0_i32 = arith.constant 0 : i32
    %c0_i32_0 = arith.constant 0 : i32
    %c0_i32_1 = arith.constant 0 : i32
    return %c0_i32, %c0_i32_0 : i32, i32
  }
  func.func @transform_7(%arg0: i32) -> (i32, i32) {
    %c0_i32 = arith.constant 0 : i32
    %c0_i32_0 = arith.constant 0 : i32
    %c0_i32_1 = arith.constant 0 : i32
    return %c0_i32, %c0_i32_0 : i32, i32
  }
  func.func @transform_8(%arg0: i32) -> (i32, i32) {
    %c0_i32 = arith.constant 0 : i32
    %c0_i32_0 = arith.constant 0 : i32
    %c0_i32_1 = arith.constant 0 : i32
    return %c0_i32, %c0_i32_0 : i32, i32
  }
  func.func @transform_9(%arg0: i32) -> (i32, i32) {
    %c0_i32 = arith.constant 0 : i32
    %c0_i32_0 = arith.constant 0 : i32
    return %arg0, %c0_i32 : i32, i32
  }
}

</mosaic_0001>

<bundles_post_ra>
// kernel: qnetwork_forward.1
= control target key start
LH: loop header
LB: loop body
LE: loop exit
PB: predicated region body
PF: predicated region fallthrough
CT: control target
= control target key end

     0   :  { %14 = vsyncpa [#allocation3], 0  ;;  %s976_s0 = inlined_call_operand.vmem [shape: f32[2,40], index: 0, kind: input, shape index: {}]   ;;  %s977_s1 = inlined_call_operand.hbm [shape: bf16[40,256], index: 1, kind: input, shape index: {}]   ;;  %s978_s2 = inlined_call_operand.vmem [shape: f32[1,256], index: 2, kind: input, shape index: {}]   ;;  %s979_s3 = inlined_call_operand.hbm [shape: bf16[256,128], index: 3, kind: input, shape index: {}]   ;;  %s980_s4 = inlined_call_operand.vmem [shape: f32[1,128], index: 4, kind: input, shape index: {}]   ;;  %s981_s5 = inlined_call_operand.vmem [shape: bf16[128,128], index: 5, kind: input, shape index: {}]   ;;  %s982_s6 = inlined_call_operand.vmem [shape: f32[1,128], index: 6, kind: input, shape index: {}]   ;;  %s983_s7 = inlined_call_operand.vmem [shape: bf16[128,8], index: 7, kind: input, shape index: {}]   ;;  %s984_s8 = inlined_call_operand.vmem [shape: f32[1,8], index: 8, kind: input, shape index: {}]   ;;  %s985_s9 = inlined_call_operand.hbm [shape: f32[2,8], index: 9, kind: output, shape index: {}]  }
   0x1   :  { %15 = vsyncpa [#allocation6], 0 }
   0x2   :  { %16 = vsyncpa [#allocation4], 0  ;;  %s824_s30 = smov [#allocation2]  }
   0x3   :  { %s24_s10 = sshll.u32 %s824_s30, 4  ;;  %s25_s10 = int_to_ptr.vmem [resolvable:$true] %s24_s10 }
   0x4   :  { %s766_s11 = scalar_lea.vmem %s25_s10, 640  ;;  %p771_p1 = scmp.lt.s32.totalorder %s25_s10, %s25_s10 }
   0x5   :  { %p767_p0 = scmp.ne.s32.totalorder %s25_s10, %s766_s11  ;;  %p772_p2 = scmp.lt.s32.totalorder %s766_s11, %s766_s11 }
   0x7   :  { %p773_p3 = por %p772_p2, %p771_p1 }
   0x9   :  { %p774_p4 = pnand %p773_p3, %p767_p0 }
   0xb   :  { %777 = shalt.err (!%p774_p4)
}
   0xc   :  { %s825_s12 = smov 128   ;;  %s826_s13 = smov 8  }
   0xd   :  { %30 = dma.hbm_to_vmem [thread:$0]  %s977_s1, 640, %s25_s10, [#allocation3], %s825_s12, %s825_s12, %s826_s13  }
   0xe   :  { %s827_s16 = smov [#allocation5]  }
   0xf   :  { %s38_s17 = sshll.u32 %s827_s16, 4  ;;  %s39_s17 = int_to_ptr.vmem [resolvable:$true] %s38_s17 }
  0x10   :  { %s786_s18 = scalar_lea.vmem %s39_s17, 2048  ;;  %p791_p6 = scmp.lt.s32.totalorder %s39_s17, %s39_s17 }
  0x11   :  { %p787_p5 = scmp.ne.s32.totalorder %s39_s17, %s786_s18  ;;  %p792_p7 = scmp.lt.s32.totalorder %s786_s18, %s786_s18 }
  0x13   :  { %p793_p8 = por %p792_p7, %p791_p6 }
  0x15   :  { %p794_p9 = pnand %p793_p8, %p787_p5 }
  0x17   :  { %797 = shalt.err (!%p794_p9)
}
  0x18   :  { %s828_s19 = smov 64   ;;  %s829_s20 = smov 4  }
  0x19   :  { %44 = dma.hbm_to_vmem [thread:$0]  %s979_s3, 2048, %s39_s17, [#allocation6], %s828_s19, %s828_s19, %s829_s20  }
  0x1a   :  { %818 = dma.done.wait [#allocation3], 640  }
  0x1b   :  { %819 = vsyncadd [#allocation3], 4294966656 }
  0x1c   :  { %820 = dma.done.wait [#allocation6], 2048  }
  0x1d   :  { %821 = vsyncadd [#allocation6], 4294965248  ;;  %v830_v0 = vmov 0   ;;  %v68_v1 = vld [vmem:[#allocation2 + $0x20] sm:$0xff]  ;;  %vm110_vm0 = vcmask 1043456   ;;  %v728_v12 = vld [vmem:[#allocation5 + $0x70] sm:$0xff]   ;;  %v71_v33 = vlaneseq }
  0x1e   :  { %149 = vmatprep.mubr.bf16.mxu0 %v830_v0  ;;  %v588_v2 = vcombine.high %v68_v1, %v68_v1  ;;  %v587_v3 = vcombine.low %v68_v1, %v68_v1  ;;  %v720_v4 = vld [vmem:[#allocation2 + $0x14] ss:$8 sps:$4 sm:$0xff]   ;;  %v722_v5 = vld [vmem:[#allocation2 + $0x10] ss:$8 sps:$4 sm:$0xff]   ;;  %v723_v7 = vld [vmem:[#allocation2 + $0x4] ss:$8 sps:$4 sm:$0xff]  }
  0x1f   :  { %v726_v8 = vld [vmem:[#allocation5 + $0x78] sm:$0xff]   ;;  %v729_v13 = vld [vmem:[#allocation5 + $0x30] sm:$0xff]   ;;  %v730_v14 = vld [vmem:[#allocation5 + $0x68] sm:$0xff]   ;;  %vm106_vm1 = vcmask 326656   ;;  %v831_v28 = vmov 0.0   ;;  %v72_v34 = vshrl.u32 %v71_v33, 7 }
  0x20   :  { %589 = vmatprep.subr.msk.bf16.mxu0 %vm110_vm0, %v588_v2  ;;  %v112_v6 = vsel %vm110_vm0, %v587_v3, 0  ;;  %v727_v9 = vld [vmem:[#allocation5 + $0x38] sm:$0xff]   ;;  %626 = vmatprep.subr.bf16.mxu1 %v726_v8  ;;  %v731_v16 = vld [vmem:[#allocation5 + $0x28] sm:$0xff]   ;;  %v732_v17 = vld [vmem:[#allocation5 + $0x60] sm:$0xff]   ;;  %vm832_vm2 = vmmov 0   ;;  %vm563_vm3 = vcmask 64512  }
  0x21   :  { %128 = vmatpush1.bf16.msra.mxu0 %v112_v6  ;;  %v725_v10 = vld [vmem:[#allocation2] ss:$8 sps:$4 sm:$0xff]   ;;  %627 = vmatpush3.bf16.msra.mxu1 %v727_v9  ;;  %v736_v21 = vld [vmem:[#allocation5 + $0x50] sm:$0xff]   ;;  %v738_v23 = vld [vmem:[#allocation5 + $0x48] sm:$0xff]   ;;  %v73_v35 = vsub.s32 0, %v72_v34  ;;  %v77_v37 = vsub.s32 1, %v72_v34 }
  0x22   :  { %129 = vmatprep.subr.bf16.mxu0 %v720_v4  ;;  %v62_v11 = vld [vmem:[%s976_s0] sm:$0xff]  ;;  %628 = vmatprep.subr.bf16.mxu1 %v728_v12  ;;  %v733_v18 = vld [vmem:[#allocation5 + $0x20] sm:$0xff]   ;;  %v737_v22 = vld [vmem:[#allocation5 + $0x10] sm:$0xff]  }
  0x23   :  { %v63_v15 = vpack.c.bf16 %v62_v11, %v62_v11  ;;  %v734_v19 = vld [vmem:[#allocation5 + $0x58] sm:$0xff]   ;;  %v739_v24 = vld [vmem:[#allocation5 + $0x8] sm:$0xff]   ;;  %v740_v25 = vld [vmem:[#allocation5 + $0x40] sm:$0xff]  }
  0x24   :  { %v735_v20 = vld [vmem:[#allocation5 + $0x18] sm:$0xff]   ;;  %v741_v26 = vld [vmem:[#allocation5] sm:$0xff]   ;;  %v742_v27 = vld [vmem:[%s981_s5 + $0x38] sm:$0xff]  }
  0x25   :  { %130 = vmatpush1.bf16.msra.mxu0 %v722_v5  ;;  %629 = vmatpush3.bf16.msra.mxu1 %v729_v13  ;;  %v743_v29 = vld [vmem:[%s981_s5 + $0x30] sm:$0xff]   ;;  %v744_v30 = vld [vmem:[%s981_s5 + $0x28] sm:$0xff]   ;;  %v745_v31 = vld [vmem:[%s981_s5 + $0x20] sm:$0xff]  }
  0x26   :  { %131 = vmatprep.subr.bf16.mxu0 %v723_v7  ;;  %630 = vmatprep.subr.bf16.mxu1 %v730_v14  ;;  %v746_v32 = vld [vmem:[%s981_s5 + $0x18] sm:$0xff]   ;;  %v69_v36 = vld [vmem:[%s978_s2] sm:$0x3]  ;;  %v747_v50 = vld [vmem:[%s981_s5 + $0x10] sm:$0xff]  }
  0x27   :  { %v74_v38 = vrot.slane %v69_v36, %v73_v35  ;;  %v78_v39 = vrot.slane %v69_v36, %v77_v37  ;;  %v748_v51 = vld [vmem:[%s981_s5 + $0x8] sm:$0xff]   ;;  %v749_v52 = vld [vmem:[%s981_s5] sm:$0xff]   ;;  %v750_v53 = vld [vmem:[%s983_s7 + $0x38] sm:$0xff]  }
  0x28   :  { %v751_v54 = vld [vmem:[%s983_s7 + $0x30] sm:$0xff]   ;;  %v752_v55 = vld [vmem:[%s983_s7 + $0x28] sm:$0xff]   ;;  %v753_v56 = vld [vmem:[%s983_s7 + $0x20] sm:$0xff]  }
  0x29   :  { %132 = vmatpush1.bf16.msra.mxu0 %v725_v10  ;;  %631 = vmatpush3.bf16.msra.mxu1 %v731_v16  ;;  %v754_v57 = vld [vmem:[%s983_s7 + $0x18] sm:$0xff]   ;;  %v755_v58 = vld [vmem:[%s983_s7 + $0x10] sm:$0xff]   ;;  %v591_v60 = vld [vmem:[%s980_s4] ss:$0 sm:$0xff] }
  0x2a   :  { %632 = vmatprep.subr.bf16.mxu1 %v732_v17  ;;  %666 = vmatprep.subr.bf16.mxu0 %v831_v28  ;;  %v756_v4 = vld [vmem:[%s983_s7 + $0x8] sm:$0xff]   ;;  %v757_v5 = vld [vmem:[%s983_s7] sm:$0xff]  }
  0x2b   :  { %v608_v6 = vld [vmem:[%s982_s6] ss:$0 sm:$0xff] }
  0x2c   :  { %590 = vmatmul.mubr.msk.bf16.vlgmr.msra.gmra.mxu0 %vm106_vm1, %v63_v15  ;;  %v617_v14 = vld [vmem:[%s984_s8] ss:$0 sm:$0xff] }
  0x2d   :  { %633 = vmatpush3.bf16.msra.mxu1 %v733_v18  ;;  %667 = vmatpush3.bf16.msra.mxu0 %v742_v27 }
  0x2e   :  { %634 = vmatprep.subr.bf16.mxu1 %v734_v19  ;;  %668 = vmatprep.subr.bf16.mxu0 %v831_v28 }
  0x2f   :  { %682 = vmatprep.mubr.msk.bf16.mxu0 %vm832_vm2, %v831_v28 }
  0x31   :  { %635 = vmatpush3.bf16.msra.mxu1 %v735_v20  ;;  %669 = vmatpush3.bf16.msra.mxu0 %v743_v29 }
  0x32   :  { %636 = vmatprep.subr.bf16.mxu1 %v736_v21  ;;  %670 = vmatprep.subr.bf16.mxu0 %v831_v28 }
  0x35   :  { %637 = vmatpush3.bf16.msra.mxu1 %v737_v22  ;;  %671 = vmatpush3.bf16.msra.mxu0 %v744_v30 }
  0x36   :  { %638 = vmatprep.subr.bf16.mxu1 %v738_v23  ;;  %672 = vmatprep.subr.bf16.mxu0 %v831_v28 }
  0x39   :  { %639 = vmatpush3.bf16.msra.mxu1 %v739_v24  ;;  %673 = vmatpush3.bf16.msra.mxu0 %v745_v31 }
  0x3a   :  { %640 = vmatprep.subr.bf16.mxu1 %v740_v25  ;;  %674 = vmatprep.subr.bf16.mxu0 %v831_v28 }
  0x3d   :  { %641 = vmatpush3.bf16.msra.mxu1 %v741_v26  ;;  %675 = vmatpush3.bf16.msra.mxu0 %v746_v32 }
  0x3e   :  { %686 = vmatprep.subr.bf16.mxu1 %v831_v28  ;;  %676 = vmatprep.subr.bf16.mxu0 %v831_v28 }
  0x41   :  { %677 = vmatpush3.bf16.msra.mxu0 %v747_v50 }
  0x42   :  { %678 = vmatprep.subr.bf16.mxu0 %v831_v28 }
  0x45   :  { %679 = vmatpush3.bf16.msra.mxu0 %v748_v51 }
  0x46   :  { %680 = vmatprep.subr.bf16.mxu0 %v831_v28 }
  0x49   :  { %681 = vmatpush3.bf16.msra.mxu0 %v749_v52 }
  0xec   :  { %v151_v40 = vpop.f32.mrf.mxu0 }
  0xed   :  { %v152_v41 = vadd.f32 %v151_v40, %v74_v38 }
  0xee   :  { %v153_v42 = vpop.f32.mrf.mxu0 }
  0xef   :  { %v154_v43 = vadd.f32 %v153_v42, %v78_v39  ;;  %v158_v44 = vmax.f32 %v152_v41, 0.0 }
  0xf0   :  { %v155_v45 = vpop.f32.mrf.mxu0 }
  0xf1   :  { %v159_v46 = vmax.f32 %v154_v43, 0.0  ;;  %v160_v49 = vpack.c.bf16 %v158_v44, %v158_v44 }
  0xf2   :  { %v156_v47 = vpop.f32.mrf.mxu0 }
  0xf3   :  { %v161_v48 = vpack.c.bf16 %v159_v46, %v159_v46 }
  0xf5   :  { %329 = vmatprep.mubr.bf16.mxu1 %v161_v48 }
  0xf6   :  { %330 = vmatmul.mubr.bf16.vlgmr.msra.gmra.mxu1 %v160_v49 }
  0xf7   :  { %702 = vmatprep.mubr.msk.bf16.mxu1 %vm832_vm2, %v831_v28  ;;  %687 = vmatpush3.bf16.msra.mxu1 %v750_v53 }
  0xf8   :  { %688 = vmatprep.subr.bf16.mxu1 %v831_v28 }
  0xfb   :  { %689 = vmatpush3.bf16.msra.mxu1 %v751_v54 }
  0xfc   :  { %690 = vmatprep.subr.bf16.mxu1 %v831_v28 }
  0xff   :  { %691 = vmatpush3.bf16.msra.mxu1 %v752_v55 }
 0x100   :  { %692 = vmatprep.subr.bf16.mxu1 %v831_v28 }
 0x103   :  { %693 = vmatpush3.bf16.msra.mxu1 %v753_v56 }
 0x104   :  { %694 = vmatprep.subr.bf16.mxu1 %v831_v28 }
 0x107   :  { %695 = vmatpush3.bf16.msra.mxu1 %v754_v57 }
 0x108   :  { %696 = vmatprep.subr.bf16.mxu1 %v831_v28 }
 0x10b   :  { %697 = vmatpush3.bf16.msra.mxu1 %v755_v58 }
 0x10c   :  { %698 = vmatprep.subr.bf16.mxu1 %v831_v28 }
 0x10f   :  { %699 = vmatpush3.bf16.msra.mxu1 %v756_v4 }
 0x110   :  { %700 = vmatprep.subr.bf16.mxu1 %v831_v28 }
 0x113   :  { %701 = vmatpush3.bf16.msra.mxu1 %v757_v5 }
 0x1b6   :  { %v642_v59 = vpop.f32.mrf.mxu1 }
 0x1b8   :  { %v643_v61 = vpop.f32.mrf.mxu1 }
 0x1b9   :  { %v644_v62 = vadd.f32 %v643_v61, %v642_v59 }
 0x1ba   :  { %v645_v63 = vpop.f32.mrf.mxu1 }
 0x1bb   :  { %v332_v0 = vadd.f32 %v644_v62, %v591_v60 }
 0x1bc   :  { %v646_v1 = vpop.f32.mrf.mxu1 }
 0x1bd   :  { %v337_v2 = vmax.f32 %v332_v0, 0.0 }
 0x1bf   :  { %v338_v3 = vpack.c.bf16 %v337_v2, %v337_v2 }
 0x1c1   :  { %683 = vmatmul.mubr.bf16.vlgmr.msra.gmra.mxu0 %v338_v3 }
 0x281   :  { %v444_v7 = vpop.f32.mrf.mxu0 }
 0x282   :  { %v445_v8 = vadd.f32 %v608_v6, %v444_v7 }
 0x283   :  { %v684_v9 = vpop.f32.mrf.mxu0 }
 0x284   :  { %v450_v10 = vmax.f32 %v445_v8, 0.0 }
 0x285   :  { %v447_v11 = vpop.f32.mrf.mxu0 }
 0x286   :  { %v451_v12 = vpack.c.bf16 %v450_v10, %v450_v10 }
 0x287   :  { %v685_v13 = vpop.f32.mrf.mxu0 }
 0x288   :  { %703 = vmatmul.mubr.bf16.vlgmr.msra.gmra.mxu1 %v451_v12 }
 0x348   :  { %v557_v15 = vpop.f32.mrf.mxu1 }
 0x349   :  { %v558_v16 = vadd.f32 %v617_v14, %v557_v15 }
 0x34a   :  { %v704_v17 = vpop.f32.mrf.mxu1 }
 0x34b   :  { %564 = vst.msk [vmem:[#allocation7] sm:$0xff] %vm563_vm3, %v558_v16 }
 0x34c   :  { %v560_v18 = vpop.f32.mrf.mxu1 }
 0x34e   :  { %v705_v19 = vpop.f32.mrf.mxu1 }
 0x34f   :  { %569 = vsyncadd [#allocation4], 96  ;;  %s833_s6 = smov [#allocation7]  }
 0x350   :  { %s570_s7 = sshll.u32 %s833_s6, 4  ;;  %s571_s7 = int_to_ptr.vmem [resolvable:$true] %s570_s7 }
 0x351   :  { %s798_s14 = scalar_lea.vmem %s571_s7, 32  ;;  %s802_s2 = scalar_lea.vmem %s571_s7, 128 }
 0x352   :  { %p799_p10 = scmp.ne.s32.totalorder %s571_s7, %s798_s14  ;;  %p803_p11 = scmp.lt.s32.totalorder %s571_s7, %s571_s7 }
 0x353   :  { %p804_p12 = scmp.lt.s32.totalorder %s802_s2, %s798_s14 }
 0x355   :  { %p805_p13 = por %p804_p12, %p803_p11 }
 0x357   :  { %p806_p0 = pnand %p805_p13, %p799_p10 }
 0x359   :  { %809 = shalt.err (!%p806_p0)
}
 0x35a   :  { %s834_s8 = smov 32   ;;  %s835_s15 = smov 2  }
 0x35b   :  { %576 = dma.vmem_to_hbm [thread:$0]  %s571_s7, 32, %s985_s9, [#allocation4], %s834_s8, %s834_s8, %s835_s15  }
 0x35c   :  { %822 = dma.done.wait [#allocation4], 128  }
 0x35d   :  { %823 = vsyncadd [#allocation4], 4294967168 }
 0x35e   :  { %580 = vsyncpa [#allocation3], 1 }
 0x35f   :  { %581 = vsyncpa [#allocation6], 1 }
 0x360   :  { %582 = vsyncpa [#allocation4], 1 }

</bundles_post_ra>
